<compile_context>
chip_gen: v5e
topology: v5e:2x2
jax: 0.10.0
libtpu: 0.0.40
codegen_flags: <defaults>
</compile_context>

<pallas_src>
import functools

import jax
import jax.numpy as jnp
from jax.experimental import pallas as pl
from jax.experimental.pallas import tpu as pltpu


def _round_up(x, m):
    return (x + m - 1) // m * m


# VMEM budget for the K-dim tiles: (tm + tn) * tk bf16 elems, double-buffered
# ~= 4 * this many bytes.  2.5M elems -> ~10 MiB, well under the 32 MiB limit.
_VMEM_BUDGET_ELEMS = 2_500_000


# ------------------------------------------------------------------ GEMM kernels

def _gemm_single_kernel(a_ref, b_ref, bias_ref, o_ref, *, relu):
    """Single-K-step C = A @ B with fused bias (+ReLU). No scratch needed."""
    y = jnp.dot(a_ref[...], b_ref[...], preferred_element_type=jnp.float32)
    y = y + bias_ref[...]
    if relu:
        y = jnp.maximum(y, 0.0)
    o_ref[...] = y.astype(o_ref.dtype)


def _gemm_single_res_kernel(a_ref, b_ref, bias_ref, r_ref, o_ref, *, relu):
    """Single-K-step GEMM with fused bias + residual add (+ReLU)."""
    y = jnp.dot(a_ref[...], b_ref[...], preferred_element_type=jnp.float32)
    y = y + bias_ref[...] + r_ref[...].astype(jnp.float32)
    if relu:
        y = jnp.maximum(y, 0.0)
    o_ref[...] = y.astype(o_ref.dtype)


def _gemm_multi_kernel(a_ref, b_ref, bias_ref, o_ref, acc_ref, *, relu):
    """Multi-K-step GEMM (f32 VMEM accumulator) with fused bias (+ReLU)."""
    @pl.when(pl.program_id(2) == 0)
    def _():
        acc_ref[...] = jnp.zeros_like(acc_ref)

    acc_ref[...] += jnp.dot(a_ref[...], b_ref[...],
                            preferred_element_type=jnp.float32)

    @pl.when(pl.program_id(2) == pl.num_programs(2) - 1)
    def _():
        y = acc_ref[...] + bias_ref[...]
        if relu:
            y = jnp.maximum(y, 0.0)
        o_ref[...] = y.astype(o_ref.dtype)


def _gemm_multi_res_kernel(a_ref, b_ref, bias_ref, r_ref, o_ref, acc_ref, *, relu):
    """Multi-K-step GEMM with fused bias + residual add (+ReLU)."""
    @pl.when(pl.program_id(2) == 0)
    def _():
        acc_ref[...] = jnp.zeros_like(acc_ref)

    acc_ref[...] += jnp.dot(a_ref[...], b_ref[...],
                            preferred_element_type=jnp.float32)

    @pl.when(pl.program_id(2) == pl.num_programs(2) - 1)
    def _():
        y = acc_ref[...] + bias_ref[...] + r_ref[...].astype(jnp.float32)
        if relu:
            y = jnp.maximum(y, 0.0)
        o_ref[...] = y.astype(o_ref.dtype)


# ------------------------------------------------------------------ other kernels

def _maxpool_kernel(ee_ref, eo_ref, oe_ref, oo_ref, o_ref):
    """3x3/stride-2 max pool from 4 even/odd row/col phase tensors."""
    Ho, Wo = o_ref.shape[1], o_ref.shape[2]
    m = jnp.maximum(ee_ref[0, 0:Ho, 0:Wo, :], ee_ref[0, 0:Ho, 1:Wo + 1, :])
    m = jnp.maximum(m, ee_ref[0, 1:Ho + 1, 0:Wo, :])
    m = jnp.maximum(m, ee_ref[0, 1:Ho + 1, 1:Wo + 1, :])
    m = jnp.maximum(m, eo_ref[0, 0:Ho, :, :])
    m = jnp.maximum(m, eo_ref[0, 1:Ho + 1, :, :])
    m = jnp.maximum(m, oe_ref[0, :, 0:Wo, :])
    m = jnp.maximum(m, oe_ref[0, :, 1:Wo + 1, :])
    m = jnp.maximum(m, oo_ref[0])
    o_ref[0] = m.astype(o_ref.dtype)


def _gap_fc_kernel(x_ref, w_ref, b_ref, o_ref, *, inv_hw):
    """Fused global-average-pool (over flattened spatial axis) + fc matmul."""
    feats = jnp.sum(x_ref[...].astype(jnp.float32), axis=1) * inv_hw     # (Nb, C)
    y = jnp.dot(feats.astype(jnp.bfloat16), w_ref[...],
                preferred_element_type=jnp.float32) + b_ref[...]
    o_ref[...] = y.astype(o_ref.dtype)


# ------------------------------------------------------------------ GEMM wrapper

def matmul_bias_act(a, b_p, bias_p, *, relu, residual=None, n_real=None,
                    out_dtype=jnp.bfloat16):
    """out = act(A @ B + bias (+ residual)).

    `b_p` (Kp, Np) and `bias_p` (1, Np) are pre-padded/pre-cast at prep time.
    A is padded here to (Mp, Kp); the real (M, n_real) window is returned.
    """
    M, K = a.shape
    Kp, Np = b_p.shape
    n_real = Np if n_real is None else n_real
    a = a.astype(jnp.bfloat16)

    # ---- tile selection -------------------------------------------------
    # Rows: biggest aligned tile (these nets have tiny M in deep layers).
    tm = None
    for cand in (512, 256, 128):
        if M % cand == 0:
            tm = cand
            break
    if tm is None:
        tm = _round_up(min(M, 128), 16)          # bf16-friendly sublane multiple
    Mp = _round_up(M, tm)

    # Cols: whole padded output width (<= 2048) -> single lane-dense N block.
    tn = Np

    # K: whole K in one step when the double-buffered A/B tiles fit the VMEM
    # budget; otherwise the largest 128-multiple divisor of Kp that fits.
    cap = max(128, _VMEM_BUDGET_ELEMS // (tm + tn))
    if Kp <= cap:
        tk = Kp
    else:
        tk = 128
        t = 256
        while t <= cap:
            if Kp % t == 0:
                tk = t
            t += 128
    nk = Kp // tk

    if (Mp, Kp) != (M, K):
        a = jnp.pad(a, ((0, Mp - M), (0, Kp - K)))

    grid = (Mp // tm, Np // tn, nk)
    in_specs = [
        pl.BlockSpec((tm, tk), lambda i, j, k: (i, k)),
        pl.BlockSpec((tk, tn), lambda i, j, k: (k, j)),
        pl.BlockSpec((1, tn), lambda i, j, k: (0, j)),
    ]
    scratch = []
    if residual is None:
        if nk == 1:
            kern = functools.partial(_gemm_single_kernel, relu=relu)
        else:
            kern = functools.partial(_gemm_multi_kernel, relu=relu)
            scratch = [pltpu.VMEM((tm, tn), jnp.float32)]
        args = (a, b_p, bias_p)
    else:
        r = residual.astype(jnp.bfloat16)
        if r.shape != (Mp, Np):
            r = jnp.pad(r, ((0, Mp - r.shape[0]), (0, Np - r.shape[1])))
        in_specs = in_specs + [pl.BlockSpec((tm, tn), lambda i, j, k: (i, j))]
        if nk == 1:
            kern = functools.partial(_gemm_single_res_kernel, relu=relu)
        else:
            kern = functools.partial(_gemm_multi_res_kernel, relu=relu)
            scratch = [pltpu.VMEM((tm, tn), jnp.float32)]
        args = (a, b_p, bias_p, r)

    out = pl.pallas_call(
        kern,
        out_shape=jax.ShapeDtypeStruct((Mp, Np), out_dtype),
        grid_spec=pltpu.PrefetchScalarGridSpec(
            num_scalar_prefetch=0,
            grid=grid,
            in_specs=in_specs,
            out_specs=pl.BlockSpec((tm, tn), lambda i, j, k: (i, j)),
            scratch_shapes=scratch),
        compiler_params=pltpu.CompilerParams(
            dimension_semantics=("parallel", "parallel", "arbitrary"),
            vmem_limit_bytes=32 * 1024 * 1024),
    )(*args)

    if (Mp, Np) != (M, n_real):
        out = out[:M, :n_real]
    return out


# ------------------------------------------------------------------ ops

def conv_bn(x, cw, relu, residual=None, out_dtype=jnp.bfloat16):
    """Conv (BN folded into the weights) via im2col + fused-epilogue GEMM."""
    N, H, W, Cin = x.shape
    kh, kw, stride, pad, cout = cw["kh"], cw["kw"], cw["stride"], cw["pad"], cw["cout"]
    Ho = (H + 2 * pad - kh) // stride + 1
    Wo = (W + 2 * pad - kw) // stride + 1
    if pad:
        x = jnp.pad(x, ((0, 0), (pad, pad), (pad, pad), (0, 0)))
    if kh == 1 and kw == 1:
        patches = x[:, ::stride, ::stride, :].reshape(N * Ho * Wo, Cin)
    else:
        cols = [x[:, ki:ki + stride * Ho:stride, kj:kj + stride * Wo:stride, :]
                for ki in range(kh) for kj in range(kw)]
        patches = jnp.concatenate(cols, axis=-1).reshape(N * Ho * Wo, kh * kw * Cin)
    res2d = None if residual is None else residual.reshape(N * Ho * Wo, cout)
    out = matmul_bias_act(patches, cw["w"], cw["b"], relu=relu,
                          residual=res2d, n_real=cout, out_dtype=out_dtype)
    return out.reshape(N, Ho, Wo, cout)


def max_pool_3x3_s2(x, out_dtype=jnp.bfloat16):
    """MaxPool2d(kernel=3, stride=2, padding=1) on NHWC."""
    N, H, W, C = x.shape
    Ho = (H + 2 - 3) // 2 + 1
    Wo = (W + 2 - 3) // 2 + 1
    neg = jnp.finfo(x.dtype).min
    xp = jnp.pad(x, ((0, 0), (1, 1), (1, 1), (0, 0)), constant_values=neg)
    # Even/odd row & column phases: total bytes == 1x the padded input.
    ee = xp[:, 0::2, 0::2, :][:, :Ho + 1, :Wo + 1, :]
    eo = xp[:, 0::2, 1::2, :][:, :Ho + 1, :Wo, :]
    oe = xp[:, 1::2, 0::2, :][:, :Ho, :Wo + 1, :]
    oo = xp[:, 1::2, 1::2, :][:, :Ho, :Wo, :]
    return pl.pallas_call(
        _maxpool_kernel,
        out_shape=jax.ShapeDtypeStruct((N, Ho, Wo, C), out_dtype),
        grid_spec=pltpu.PrefetchScalarGridSpec(
            num_scalar_prefetch=0,
            grid=(N,),
            in_specs=[
                pl.BlockSpec((1, Ho + 1, Wo + 1, C), lambda n: (n, 0, 0, 0)),
                pl.BlockSpec((1, Ho + 1, Wo, C), lambda n: (n, 0, 0, 0)),
                pl.BlockSpec((1, Ho, Wo + 1, C), lambda n: (n, 0, 0, 0)),
                pl.BlockSpec((1, Ho, Wo, C), lambda n: (n, 0, 0, 0)),
            ],
            out_specs=pl.BlockSpec((1, Ho, Wo, C), lambda n: (n, 0, 0, 0))),
        compiler_params=pltpu.CompilerParams(dimension_semantics=("parallel",)),
    )(ee, eo, oe, oo)


def gap_fc(x, fc):
    """Fused AdaptiveAvgPool2d((1,1)) + Linear on NHWC -> (N, num_classes)."""
    N, H, W, C = x.shape
    HW = H * W
    Np_out = fc["w"].shape[1]
    Nb = max(8, _round_up(N, 8))               # MXU-friendly row count
    xr = x.reshape(N, HW, C)
    if Nb != N:
        xr = jnp.pad(xr, ((0, Nb - N), (0, 0), (0, 0)))
    out = pl.pallas_call(
        functools.partial(_gap_fc_kernel, inv_hw=1.0 / HW),
        out_shape=jax.ShapeDtypeStruct((Nb, Np_out), jnp.float32),
        grid_spec=pltpu.PrefetchScalarGridSpec(
            num_scalar_prefetch=0,
            grid=(1,),
            in_specs=[pl.BlockSpec((Nb, HW, C), lambda i: (0, 0, 0)),
                      pl.BlockSpec((C, Np_out), lambda i: (0, 0)),
                      pl.BlockSpec((1, Np_out), lambda i: (0, 0))],
            out_specs=pl.BlockSpec((Nb, Np_out), lambda i: (0, 0))),
    )(xr, fc["w"], fc["b"])
    return out[:N, :fc["nc"]]


# ------------------------------------------------------------------ parameters

class ParamGen:
    def __init__(self, seed=0):
        self.key = jax.random.PRNGKey(seed)
        self.i = 0

    def next(self):
        self.i += 1
        return jax.random.fold_in(self.key, self.i)


def init_conv(pg, kh, kw, cin, cout):
    fan_in = kh * kw * cin
    return (jax.random.normal(pg.next(), (kh, kw, cin, cout), jnp.float32)
            * (1.0 / jnp.sqrt(fan_in)))


def init_bn(pg, c):
    return {
        "gamma": 1.0 + 0.1 * jax.random.normal(pg.next(), (c,), jnp.float32),
        "beta": 0.1 * jax.random.normal(pg.next(), (c,), jnp.float32),
        "mean": 0.1 * jax.random.normal(pg.next(), (c,), jnp.float32),
        "var": 1.0 + 0.1 * jax.random.uniform(pg.next(), (c,), jnp.float32),
    }


def init_bottleneck(pg, inplanes, planes, stride, downsample):
    p = {
        "conv1": init_conv(pg, 1, 1, inplanes, planes),
        "bn1": init_bn(pg, planes),
        "conv2": init_conv(pg, 3, 3, planes, planes),
        "bn2": init_bn(pg, planes),
        "conv3": init_conv(pg, 1, 1, planes, planes * 4),
        "bn3": init_bn(pg, planes * 4),
        "stride": stride,
    }
    if downsample:
        p["ds_conv"] = init_conv(pg, 1, 1, inplanes, planes * 4)
        p["ds_bn"] = init_bn(pg, planes * 4)
    return p


def init_resnet50(pg, num_classes=4):
    params = {
        "conv1": init_conv(pg, 7, 7, 3, 64),
        "bn1": init_bn(pg, 64),
    }
    layers = []
    inplanes = 64
    cfg = [(64, 3, 1), (128, 4, 2), (256, 6, 2), (512, 3, 2)]
    for planes, blocks, stride in cfg:
        blk_params = []
        for b in range(blocks):
            s = stride if b == 0 else 1
            ds = (b == 0) and (s != 1 or inplanes != planes * 4)
            blk_params.append(init_bottleneck(pg, inplanes, planes, s, ds))
            inplanes = planes * 4
        layers.append(blk_params)
    params["layers"] = layers
    params["fc_w"] = (jax.random.normal(pg.next(), (2048, num_classes), jnp.float32)
                      * (1.0 / jnp.sqrt(2048)))
    params["fc_b"] = 0.01 * jax.random.normal(pg.next(), (num_classes,), jnp.float32)
    return params


# ------------------------------------------------------------------ prep (BN folding + padding, done once)

def fold_conv_bn(w, bn, eps=1e-5):
    scale = bn["gamma"] / jnp.sqrt(bn["var"] + eps)
    bias = bn["beta"] - bn["mean"] * scale
    return w * scale[None, None, None, :], bias


def pack_conv(w, bias, stride, pad):
    kh, kw, cin, cout = w.shape
    K = kh * kw * cin
    Kp = _round_up(K, 128)
    Np = _round_up(cout, 128)
    w_mat = w.reshape(K, cout)
    return {
        "w": jnp.pad(w_mat, ((0, Kp - K), (0, Np - cout))).astype(jnp.bfloat16),
        "b": jnp.pad(bias, (0, Np - cout)).reshape(1, Np).astype(jnp.float32),
        "kh": kh, "kw": kw, "stride": stride, "pad": pad, "cout": cout,
    }


def prepare_inference_params(params, num_classes=4):
    prep = {}
    w, b = fold_conv_bn(params["conv1"], params["bn1"])
    prep["conv1"] = pack_conv(w, b, stride=2, pad=3)
    layers = []
    for layer in params["layers"]:
        blks = []
        for p in layer:
            blk = {}
            w, b = fold_conv_bn(p["conv1"], p["bn1"])
            blk["conv1"] = pack_conv(w, b, stride=1, pad=0)
            w, b = fold_conv_bn(p["conv2"], p["bn2"])
            blk["conv2"] = pack_conv(w, b, stride=p["stride"], pad=1)
            w, b = fold_conv_bn(p["conv3"], p["bn3"])
            blk["conv3"] = pack_conv(w, b, stride=1, pad=0)
            if "ds_conv" in p:
                w, b = fold_conv_bn(p["ds_conv"], p["ds_bn"])
                blk["ds"] = pack_conv(w, b, stride=p["stride"], pad=0)
            blks.append(blk)
        layers.append(blks)
    prep["layers"] = layers
    Np = _round_up(num_classes, 128)
    prep["fc"] = {
        "w": jnp.pad(params["fc_w"],
                     ((0, 0), (0, Np - num_classes))).astype(jnp.bfloat16),
        "b": jnp.pad(params["fc_b"],
                     (0, Np - num_classes)).reshape(1, Np).astype(jnp.float32),
        "nc": num_classes,
    }
    return prep


# ------------------------------------------------------------------ forward

def bottleneck_forward(x, p):
    if "ds" in p:
        identity = conv_bn(x, p["ds"], relu=False)
    else:
        identity = x
    out = conv_bn(x, p["conv1"], relu=True)
    out = conv_bn(out, p["conv2"], relu=True)
    # conv3 + BN-bias + residual-add + ReLU fused into one GEMM epilogue.
    out = conv_bn(out, p["conv3"], relu=True, residual=identity)
    return out


def cnn_model_forward(prepared, x_nchw):
    """Equivalent of CNNModel.forward (resnet50 with 4-way fc), eval mode."""
    x = jnp.transpose(x_nchw, (0, 2, 3, 1)).astype(jnp.bfloat16)  # NCHW -> NHWC
    x = conv_bn(x, prepared["conv1"], relu=True, out_dtype=jnp.float32)
    x = max_pool_3x3_s2(x, out_dtype=jnp.bfloat16)
    for layer in prepared["layers"]:
        for blk in layer:
            x = bottleneck_forward(x, blk)
    logits = gap_fc(x, prepared["fc"])            # fused avgpool + fc (+bias)
    return logits


# ------------------------------------------------------------------ main

if __name__ == "__main__":
    pg = ParamGen(seed=0)
    raw_params = init_resnet50(pg, num_classes=4)
    params = prepare_inference_params(raw_params, num_classes=4)

    # Small PyTorch-style NCHW input (batch=2, 3 channels, 32x32 spatial).
    x = jax.random.normal(jax.random.PRNGKey(0), (2, 3, 32, 32), jnp.float32)

    logits = cnn_model_forward(params, x)
    logits = jax.block_until_ready(logits)
    assert logits.shape == (2, 4) and bool(jnp.all(jnp.isfinite(logits)))
    print("KERNEL_OK")
</pallas_src>

<mosaic_0001>
module attributes {stable_mosaic.version = 11 : i64} {
  func.func @_gemm_single_kernel(%arg0: i32, %arg1: i32, %arg2: i32, %arg3: memref<512x256xbf16, #tpu.memory_space<vmem>>, %arg4: memref<256x128xbf16, #tpu.memory_space<vmem>>, %arg5: memref<1x128xf32, #tpu.memory_space<vmem>>, %arg6: memref<512x128xf32, #tpu.memory_space<vmem>>) attributes {dimension_semantics = [#tpu.dimension_semantics<parallel>, #tpu.dimension_semantics<parallel>, #tpu.dimension_semantics<arbitrary>], iteration_bounds = array<i64: 1, 1, 1>, scalar_prefetch = 0 : i64, scratch_operands = 0 : i64, tpu.core_type = #tpu.core_type<tc>, window_params = [{transform_indices = @transform_0, window_bounds = array<i64: 512, 256>}, {transform_indices = @transform_1, window_bounds = array<i64: 256, 128>}, {transform_indices = @transform_2, window_bounds = array<i64: 1, 128>}, {transform_indices = @transform_3, window_bounds = array<i64: 512, 128>}]} {
    %c0 = arith.constant 0 : index
    %c0_0 = arith.constant 0 : index
    %0 = vector.load %arg3[%c0, %c0_0] : memref<512x256xbf16, #tpu.memory_space<vmem>>, vector<512x256xbf16>
    %c0_1 = arith.constant 0 : index
    %c0_2 = arith.constant 0 : index
    %1 = vector.load %arg4[%c0_1, %c0_2] : memref<256x128xbf16, #tpu.memory_space<vmem>>, vector<256x128xbf16>
    %cst = arith.constant dense<0.000000e+00> : vector<512x128xf32>
    %2 = tpu.matmul %0, %1, %cst {dimension_numbers = #tpu.dot_dimension_numbers<[1], [0], [0], [1], [0, 0, 1, 1], [], []>} : vector<512x256xbf16>, vector<256x128xbf16>, vector<512x128xf32> -> vector<512x128xf32>
    %c0_3 = arith.constant 0 : index
    %c0_4 = arith.constant 0 : index
    %3 = vector.load %arg5[%c0_3, %c0_4] : memref<1x128xf32, #tpu.memory_space<vmem>>, vector<1x128xf32>
    %4 = vector.broadcast %3 : vector<1x128xf32> to vector<512x128xf32>
    %5 = arith.addf %2, %4 : vector<512x128xf32>
    %cst_5 = arith.constant 0.000000e+00 : f32
    %6 = vector.broadcast %cst_5 : f32 to vector<512x128xf32>
    %7 = arith.maximumf %5, %6 : vector<512x128xf32>
    %c0_6 = arith.constant 0 : index
    %c0_7 = arith.constant 0 : index
    %8 = vector.load %arg6[%c0_6, %c0_7] : memref<512x128xf32, #tpu.memory_space<vmem>>, vector<512x128xf32>
    tpu.vector_store %arg6[%c0_6, %c0_7], %7 {strides = array<i32>} : memref<512x128xf32, #tpu.memory_space<vmem>>, vector<512x128xf32>,
    return
  }
  func.func @transform_0(%arg0: i32, %arg1: i32, %arg2: i32) -> (i32, i32) {
    %c0_i32 = arith.constant 0 : i32
    return %arg0, %arg2 : i32, i32
  }
  func.func @transform_1(%arg0: i32, %arg1: i32, %arg2: i32) -> (i32, i32) {
    %c0_i32 = arith.constant 0 : i32
    return %arg2, %arg1 : i32, i32
  }
  func.func @transform_2(%arg0: i32, %arg1: i32, %arg2: i32) -> (i32, i32) {
    %c0_i32 = arith.constant 0 : i32
    %c0_i32_0 = arith.constant 0 : i32
    return %c0_i32, %arg1 : i32, i32
  }
  func.func @transform_3(%arg0: i32, %arg1: i32, %arg2: i32) -> (i32, i32) {
    %c0_i32 = arith.constant 0 : i32
    return %arg0, %arg1 : i32, i32
  }
}

</mosaic_0001>

<bundles_post_ra>
// kernel: tpu_custom_call.1
= control target key start
LH: loop header
LB: loop body
LE: loop exit
PB: predicated region body
PF: predicated region fallthrough
CT: control target
= control target key end

     0   :  { %8 = vsyncpa [#allocation3], 0  ;;  %s1662_s0 = inlined_call_operand.hbm [shape: bf16[512,256], index: 0, kind: input, shape index: {}]   ;;  %s1663_s1 = inlined_call_operand.hbm [shape: bf16[256,128], index: 1, kind: input, shape index: {}]   ;;  %s1664_s2 = inlined_call_operand.vmem [shape: f32[1,128], index: 2, kind: input, shape index: {}]   ;;  %s1665_s3 = inlined_call_operand.hbm [shape: f32[512,128], index: 3, kind: output, shape index: {}]  }
   0x1   :  { %9 = vsyncpa [#allocation6], 0 }
   0x2   :  { %10 = vsyncpa [#allocation4], 0  ;;  %s15_s14 = sshll.u32 %s1662_s0, 4  ;;  %s1551_s15 = smov [#allocation2]   ;;  %s16_s14 = int_to_ptr.hbm [resolvable:$true] %s15_s14 }
   0x3   :  { %s17_s16 = sshll.u32 %s1551_s15, 4  ;;  %s28_s19 = sshll.u32 %s1663_s1, 4  ;;  %s18_s16 = int_to_ptr.vmem [resolvable:$true] %s17_s16  ;;  %s29_s19 = int_to_ptr.hbm [resolvable:$true] %s28_s19 }
   0x4   :  { %s1552_s20 = smov 128   ;;  %s1553_s21 = smov 8  }
   0x5   :  { %23 = dma.hbm_to_vmem [thread:$0]  %s16_s14, 8192, %s18_s16, [#allocation3], %s1552_s20, %s1552_s20, %s1553_s21  }
   0x6   :  { %s1554_s22 = smov [#allocation5]   ;;  %s1555_s24 = smov 64  }
   0x7   :  { %s30_s23 = sshll.u32 %s1554_s22, 4  ;;  %s1556_s0 = smov 4   ;;  %s31_s23 = int_to_ptr.vmem [resolvable:$true] %s30_s23 }
   0x8   :  { %36 = dma.hbm_to_vmem [thread:$0]  %s29_s19, 2048, %s31_s23, [#allocation6], %s1555_s24, %s1555_s24, %s1556_s0  }
   0x9   :  { %1545 = dma.done.wait [#allocation3], 8192  }
   0xa   :  { %1546 = vsyncadd [#allocation3], 4294959104 }
   0xb   :  { %1547 = dma.done.wait [#allocation6], 2048  }
   0xc   :  { %1548 = vsyncadd [#allocation6], 4294965248  ;;  %v1440_v0 = vld [vmem:[#allocation5 + $0x38] sm:$0xff]  ;;  %v1439_v2 = vld [vmem:[#allocation5 + $0x30] sm:$0xff]  ;;  %s1035_s29 = sshll.u32 %s1665_s3, 4  ;;  %s1036_s29 = int_to_ptr.hbm [resolvable:$true] %s1035_s29 }
   0xd   :  { %v1448_v1 = vld [vmem:[#allocation5 + $0x78] sm:$0xff]  ;;  %563 = vmatpush.bf16.msra.mxu0 %v1440_v0  ;;  %1449 = vmatpush.bf16.msra.mxu2 %v1440_v0  ;;  %v1447_v3 = vld [vmem:[#allocation5 + $0x70] sm:$0xff]  ;;  %v1438_v4 = vld [vmem:[#allocation5 + $0x28] sm:$0xff] }
   0xe   :  { %732 = vmatpush.bf16.msra.mxu1 %v1448_v1  ;;  %1457 = vmatpush.bf16.msra.mxu3 %v1448_v1  ;;  %v1446_v5 = vld [vmem:[#allocation5 + $0x68] sm:$0xff]  ;;  %v1437_v6 = vld [vmem:[#allocation5 + $0x20] sm:$0xff]  ;;  %v1436_v8 = vld [vmem:[#allocation5 + $0x18] sm:$0xff] }
   0xf   :  { %v1445_v7 = vld [vmem:[#allocation5 + $0x60] sm:$0xff]  ;;  %v1444_v9 = vld [vmem:[#allocation5 + $0x58] sm:$0xff]  ;;  %v1435_v10 = vld [vmem:[#allocation5 + $0x10] sm:$0xff] }
  0x10   :  { %v1443_v11 = vld [vmem:[#allocation5 + $0x50] sm:$0xff]  ;;  %v1434_v12 = vld [vmem:[#allocation5 + $0x8] sm:$0xff]  ;;  %v1433_v14 = vld [vmem:[#allocation5] sm:$0xff] }
  0x11   :  { %564 = vmatpush.bf16.msra.mxu0 %v1439_v2  ;;  %1450 = vmatpush.bf16.msra.mxu2 %v1439_v2  ;;  %v1442_v13 = vld [vmem:[#allocation5 + $0x48] sm:$0xff]  ;;  %v1441_v15 = vld [vmem:[#allocation5 + $0x40] sm:$0xff]  ;;  %v1059_v28 = vld [vmem:[#allocation2 + $0x10] sm:$0xf] }
  0x12   :  { %733 = vmatpush.bf16.msra.mxu1 %v1447_v3  ;;  %1458 = vmatpush.bf16.msra.mxu3 %v1447_v3  ;;  %v1051_v16 = vld [vmem:[#allocation2] sm:$0xf]  ;;  %v1370_v17 = vld [vmem:[#allocation2 + $0x4] sm:$0xf0]  ;;  %v1369_v20 = vld [vmem:[#allocation2 + $0x4] sm:$0xf] }
  0x13   :  { %v1179_v18 = vld [vmem:[#allocation2 + $0x100] sm:$0xf]  ;;  %v1402_v19 = vld [vmem:[#allocation2 + $0x104] sm:$0xf0]  ;;  %v1053_v21 = vld [vmem:[#allocation2 + $0x8] sm:$0xf0]  ;;  %v1052_v24 = vor.u32 %v1370_v17, %v1051_v16 }
  0x14   :  { %v1401_v22 = vld [vmem:[#allocation2 + $0x104] sm:$0xf]  ;;  %v1181_v23 = vld [vmem:[#allocation2 + $0x108] sm:$0xf0]  ;;  %v1180_v25 = vor.u32 %v1402_v19, %v1179_v18  ;;  %v1056_v26 = vor.u32 %v1369_v20, %v1053_v21  ;;  %v1372_v29 = vld [vmem:[#allocation2 + $0x14] sm:$0xf0] }
  0x15   :  { %565 = vmatpush.bf16.msra.mxu0 %v1438_v4  ;;  %1451 = vmatpush.bf16.msra.mxu2 %v1438_v4  ;;  %v1184_v27 = vor.u32 %v1401_v22, %v1181_v23  ;;  %v1187_v30 = vld [vmem:[#allocation2 + $0x110] sm:$0xf]  ;;  %v1404_v31 = vld [vmem:[#allocation2 + $0x114] sm:$0xf0]  ;;  %v1371_v32 = vld [vmem:[#allocation2 + $0x14] sm:$0xf]  ;;  %v1060_v36 = vor.u32 %v1372_v29, %v1059_v28 }
  0x16   :  { %734 = vmatpush.bf16.msra.mxu1 %v1446_v5  ;;  %1459 = vmatpush.bf16.msra.mxu3 %v1446_v5  ;;  %v1061_v33 = vld [vmem:[#allocation2 + $0x18] sm:$0xf0]  ;;  %v1403_v34 = vld [vmem:[#allocation2 + $0x114] sm:$0xf]  ;;  %v1188_v37 = vor.u32 %v1404_v31, %v1187_v30  ;;  %v1067_v40 = vld [vmem:[#allocation2 + $0x20] sm:$0xf] }
  0x17   :  { %v1189_v35 = vld [vmem:[#allocation2 + $0x118] sm:$0xf0]  ;;  %v1064_v38 = vor.u32 %v1371_v32, %v1061_v33  ;;  %v1374_v41 = vld [vmem:[#allocation2 + $0x24] sm:$0xf0]  ;;  %v1195_v42 = vld [vmem:[#allocation2 + $0x120] sm:$0xf] }
  0x18   :  { %v1192_v39 = vor.u32 %v1403_v34, %v1189_v35  ;;  %v1406_v43 = vld [vmem:[#allocation2 + $0x124] sm:$0xf0]  ;;  %v1373_v44 = vld [vmem:[#allocation2 + $0x24] sm:$0xf]  ;;  %v1069_v45 = vld [vmem:[#allocation2 + $0x28] sm:$0xf0]  ;;  %v1068_v48 = vor.u32 %v1374_v41, %v1067_v40 }
  0x19   :  { %566 = vmatpush.bf16.msra.mxu0 %v1437_v6  ;;  %1452 = vmatpush.bf16.msra.mxu2 %v1437_v6  ;;  %v1405_v46 = vld [vmem:[#allocation2 + $0x124] sm:$0xf]  ;;  %v1197_v47 = vld [vmem:[#allocation2 + $0x128] sm:$0xf0]  ;;  %v1196_v49 = vor.u32 %v1406_v43, %v1195_v42  ;;  %v1072_v50 = vor.u32 %v1373_v44, %v1069_v45  ;;  %v1075_v52 = vld [vmem:[#allocation2 + $0x30] sm:$0xf] }
  0x1a   :  { %735 = vmatpush.bf16.msra.mxu1 %v1445_v7  ;;  %1460 = vmatpush.bf16.msra.mxu3 %v1445_v7  ;;  %v1200_v51 = vor.u32 %v1405_v46, %v1197_v47  ;;  %v1376_v53 = vld [vmem:[#allocation2 + $0x34] sm:$0xf0]  ;;  %v1203_v54 = vld [vmem:[#allocation2 + $0x130] sm:$0xf]  ;;  %v1375_v56 = vld [vmem:[#allocation2 + $0x34] sm:$0xf] }
  0x1b   :  { %v1408_v55 = vld [vmem:[#allocation2 + $0x134] sm:$0xf0]  ;;  %v1077_v57 = vld [vmem:[#allocation2 + $0x38] sm:$0xf0]  ;;  %v1407_v58 = vld [vmem:[#allocation2 + $0x134] sm:$0xf]  ;;  %v1076_v60 = vor.u32 %v1376_v53, %v1075_v52 }
  0x1c   :  { %v1205_v59 = vld [vmem:[#allocation2 + $0x138] sm:$0xf0]  ;;  %v1204_v61 = vor.u32 %v1408_v55, %v1203_v54  ;;  %v1080_v62 = vor.u32 %v1375_v56, %v1077_v57  ;;  %v1083_v0 = vld [vmem:[#allocation2 + $0x40] sm:$0xf]  ;;  %v1378_v1 = vld [vmem:[#allocation2 + $0x44] sm:$0xf0] }
  0x1d   :  { %567 = vmatpush.bf16.msra.mxu0 %v1436_v8  ;;  %1453 = vmatpush.bf16.msra.mxu2 %v1436_v8  ;;  %v1208_v63 = vor.u32 %v1407_v58, %v1205_v59  ;;  %v1211_v2 = vld [vmem:[#allocation2 + $0x140] sm:$0xf]  ;;  %v1410_v3 = vld [vmem:[#allocation2 + $0x144] sm:$0xf0]  ;;  %v1377_v4 = vld [vmem:[#allocation2 + $0x44] sm:$0xf]  ;;  %v1084_v8 = vor.u32 %v1378_v1, %v1083_v0 }
  0x1e   :  { %736 = vmatpush.bf16.msra.mxu1 %v1444_v9  ;;  %1461 = vmatpush.bf16.msra.mxu3 %v1444_v9  ;;  %v1085_v5 = vld [vmem:[#allocation2 + $0x48] sm:$0xf0]  ;;  %v1409_v6 = vld [vmem:[#allocation2 + $0x144] sm:$0xf]  ;;  %v1212_v9 = vor.u32 %v1410_v3, %v1211_v2  ;;  %v1379_v16 = vld [vmem:[#allocation2 + $0x54] sm:$0xf] }
  0x1f   :  { %v1213_v7 = vld [vmem:[#allocation2 + $0x148] sm:$0xf0]  ;;  %v1093_v17 = vld [vmem:[#allocation2 + $0x58] sm:$0xf0]  ;;  %v1411_v18 = vld [vmem:[#allocation2 + $0x154] sm:$0xf] }
  0x20   :  { %v1221_v19 = vld [vmem:[#allocation2 + $0x158] sm:$0xf0]  ;;  %v1096_v22 = vor.u32 %v1379_v16, %v1093_v17  ;;  %v1381_v28 = vld [vmem:[#allocation2 + $0x64] sm:$0xf]  ;;  %v1101_v29 = vld [vmem:[#allocation2 + $0x68] sm:$0xf0] }
  0x21   :  { %568 = vmatpush.bf16.msra.mxu0 %v1435_v10  ;;  %1454 = vmatpush.bf16.msra.mxu2 %v1435_v10  ;;  %v1088_v10 = vor.u32 %v1377_v4, %v1085_v5  ;;  %v1224_v23 = vor.u32 %v1411_v18, %v1221_v19  ;;  %v1413_v30 = vld [vmem:[#allocation2 + $0x164] sm:$0xf]  ;;  %v1229_v31 = vld [vmem:[#allocation2 + $0x168] sm:$0xf0]  ;;  %v1104_v34 = vor.u32 %v1381_v28, %v1101_v29  ;;  %v1383_v40 = vld [vmem:[#allocation2 + $0x74] sm:$0xf] }
  0x22   :  { %737 = vmatpush.bf16.msra.mxu1 %v1443_v11  ;;  %1462 = vmatpush.bf16.msra.mxu3 %v1443_v11  ;;  %v1216_v11 = vor.u32 %v1409_v6, %v1213_v7  ;;  %v1232_v35 = vor.u32 %v1413_v30, %v1229_v31  ;;  %v1109_v41 = vld [vmem:[#allocation2 + $0x78] sm:$0xf0]  ;;  %v1415_v42 = vld [vmem:[#allocation2 + $0x174] sm:$0xf]  ;;  %v1418_v52 = vld [vmem:[#allocation2 + $0x184] sm:$0xf0] }
  0x23   :  { %v1237_v43 = vld [vmem:[#allocation2 + $0x178] sm:$0xf0]  ;;  %v1112_v46 = vor.u32 %v1383_v40, %v1109_v41  ;;  %v1385_v53 = vld [vmem:[#allocation2 + $0x84] sm:$0xf]  ;;  %v1117_v54 = vld [vmem:[#allocation2 + $0x88] sm:$0xf0] }
  0x24   :  { %v1240_v47 = vor.u32 %v1415_v42, %v1237_v43  ;;  %v1417_v55 = vld [vmem:[#allocation2 + $0x184] sm:$0xf]  ;;  %v1245_v56 = vld [vmem:[#allocation2 + $0x188] sm:$0xf0]  ;;  %v1125_v16 = vld [vmem:[#allocation2 + $0x98] sm:$0xf0] }
  0x25   :  { %569 = vmatpush.bf16.msra.mxu0 %v1434_v12  ;;  %1455 = vmatpush.bf16.msra.mxu2 %v1434_v12  ;;  %v1091_v12 = vld [vmem:[#allocation2 + $0x50] sm:$0xf]  ;;  %v1419_v18 = vld [vmem:[#allocation2 + $0x194] sm:$0xf]  ;;  %v1253_v19 = vld [vmem:[#allocation2 + $0x198] sm:$0xf0] }
  0x26   :  { %738 = vmatpush.bf16.msra.mxu1 %v1442_v13  ;;  %1463 = vmatpush.bf16.msra.mxu3 %v1442_v13  ;;  %v1380_v13 = vld [vmem:[#allocation2 + $0x54] sm:$0xf0]  ;;  %v1131_v41 = vld [vmem:[#allocation2 + $0xa0] sm:$0xf] }
  0x27   :  { %v1092_v20 = vor.u32 %v1380_v13, %v1091_v12  ;;  %v1388_v12 = vld [vmem:[#allocation2 + $0x94] sm:$0xf0]  ;;  %v1251_v13 = vld [vmem:[#allocation2 + $0x190] sm:$0xf] }
  0x29   :  { %570 = vmatpush.bf16.msra.mxu0 %v1433_v14  ;;  %1456 = vmatpush.bf16.msra.mxu2 %v1433_v14  ;;  %v1219_v14 = vld [vmem:[#allocation2 + $0x150] sm:$0xf] }
  0x2a   :  { %739 = vmatpush.bf16.msra.mxu1 %v1441_v15  ;;  %1464 = vmatpush.bf16.msra.mxu3 %v1441_v15  ;;  %v1412_v15 = vld [vmem:[#allocation2 + $0x154] sm:$0xf0] }
  0x2b   :  { %v1220_v21 = vor.u32 %v1412_v15, %v1219_v14  ;;  %v1420_v14 = vld [vmem:[#allocation2 + $0x194] sm:$0xf0]  ;;  %v1387_v15 = vld [vmem:[#allocation2 + $0x94] sm:$0xf] }
  0x2c   :  { %571 = vmatmul.bf16.vlgmr.msra.gmra.mxu0 %v1052_v24  ;;  %651 = vmatmul.bf16.vlgmr.msra.gmra.mxu2 %v1180_v25  ;;  %v1099_v24 = vld [vmem:[#allocation2 + $0x60] sm:$0xf]  ;;  %v1382_v25 = vld [vmem:[#allocation2 + $0x64] sm:$0xf0] }
  0x2d   :  { %740 = vmatmul.bf16.vlgmr.msra.gmra.mxu1 %v1056_v26  ;;  %820 = vmatmul.bf16.vlgmr.msra.gmra.mxu3 %v1184_v27  ;;  %v1227_v26 = vld [vmem:[#allocation2 + $0x160] sm:$0xf]  ;;  %v1414_v27 = vld [vmem:[#allocation2 + $0x164] sm:$0xf0]  ;;  %v1100_v32 = vor.u32 %v1382_v25, %v1099_v24  ;;  %v1252_v24 = vor.u32 %v1420_v14, %v1251_v13  ;;  %v1392_v13 = vld [vmem:[#allocation2 + $0xb4] sm:$0xf0] }
  0x2e   :  { %v1228_v33 = vor.u32 %v1414_v27, %v1227_v26  ;;  %v1128_v26 = vor.u32 %v1387_v15, %v1125_v16  ;;  %v1256_v27 = vor.u32 %v1419_v18, %v1253_v19  ;;  %v1267_v14 = vld [vmem:[#allocation2 + $0x1b0] sm:$0xf]  ;;  %v1424_v15 = vld [vmem:[#allocation2 + $0x1b4] sm:$0xf0]  ;;  %v1391_v16 = vld [vmem:[#allocation2 + $0xb4] sm:$0xf] }
  0x2f   :  { %v1423_v19 = vld [vmem:[#allocation2 + $0x1b4] sm:$0xf] }
  0x3c   :  { %576 = vmatmul.bf16.gmra.mxu0 %v1060_v36  ;;  %656 = vmatmul.bf16.gmra.mxu2 %v1188_v37  ;;  %v1107_v36 = vld [vmem:[#allocation2 + $0x70] sm:$0xf]  ;;  %v1384_v37 = vld [vmem:[#allocation2 + $0x74] sm:$0xf0] }
  0x3d   :  { %745 = vmatmul.bf16.gmra.mxu1 %v1064_v38  ;;  %825 = vmatmul.bf16.gmra.mxu3 %v1192_v39  ;;  %v1235_v38 = vld [vmem:[#allocation2 + $0x170] sm:$0xf]  ;;  %v1416_v39 = vld [vmem:[#allocation2 + $0x174] sm:$0xf0]  ;;  %v1108_v44 = vor.u32 %v1384_v37, %v1107_v36 }
  0x3e   :  { %v1236_v45 = vor.u32 %v1416_v39, %v1235_v38 }
  0x4c   :  { %581 = vmatmul.bf16.gmra.mxu0 %v1068_v48  ;;  %661 = vmatmul.bf16.gmra.mxu2 %v1196_v49  ;;  %v1590_v48 = vld [vmem:[%s1664_s2] ss:$0 sm:$0xff]  ;;  %s1557_s2 = smov [#allocation7]  }
  0x4d   :  { %750 = vmatmul.bf16.gmra.mxu1 %v1072_v50  ;;  %830 = vmatmul.bf16.gmra.mxu3 %v1200_v51  ;;  %v1115_v49 = vld [vmem:[#allocation2 + $0x80] sm:$0xf]  ;;  %v1386_v50 = vld [vmem:[#allocation2 + $0x84] sm:$0xf0]  ;;  %s1033_s26 = sshll.u32 %s1557_s2, 4  ;;  %s1034_s26 = int_to_ptr.vmem [resolvable:$true] %s1033_s26 }
  0x4e   :  { %v1243_v51 = vld [vmem:[#allocation2 + $0x180] sm:$0xf]  ;;  %v1116_v57 = vor.u32 %v1386_v50, %v1115_v49  ;;  %v1133_v49 = vld [vmem:[#allocation2 + $0xa8] sm:$0xf0] }
  0x4f   :  { %v1244_v58 = vor.u32 %v1418_v52, %v1243_v51  ;;  %v1421_v51 = vld [vmem:[#allocation2 + $0x1a4] sm:$0xf]  ;;  %v1261_v52 = vld [vmem:[#allocation2 + $0x1a8] sm:$0xf0] }
  0x5c   :  { %586 = vmatmul.bf16.gmra.mxu0 %v1076_v60  ;;  %666 = vmatmul.bf16.gmra.mxu2 %v1204_v61  ;;  %v1120_v60 = vor.u32 %v1385_v53, %v1117_v54  ;;  %v1248_v61 = vor.u32 %v1417_v55, %v1245_v56 }
  0x5d   :  { %755 = vmatmul.bf16.gmra.mxu1 %v1080_v62  ;;  %835 = vmatmul.bf16.gmra.mxu3 %v1208_v63 }
  0x6c   :  { %591 = vmatmul.bf16.gmra.mxu0 %v1084_v8  ;;  %671 = vmatmul.bf16.gmra.mxu2 %v1212_v9  ;;  %v1123_v9 = vld [vmem:[#allocation2 + $0x90] sm:$0xf] }
  0x6d   :  { %760 = vmatmul.bf16.gmra.mxu1 %v1088_v10  ;;  %840 = vmatmul.bf16.gmra.mxu3 %v1216_v11 }
  0x7c   :  { %596 = vmatmul.bf16.gmra.mxu0 %v1092_v20  ;;  %676 = vmatmul.bf16.gmra.mxu2 %v1220_v21 }
  0x7d   :  { %765 = vmatmul.bf16.gmra.mxu1 %v1096_v22  ;;  %845 = vmatmul.bf16.gmra.mxu3 %v1224_v23  ;;  %v1124_v23 = vor.u32 %v1388_v12, %v1123_v9 }
  0x8c   :  { %601 = vmatmul.bf16.gmra.mxu0 %v1100_v32  ;;  %681 = vmatmul.bf16.gmra.mxu2 %v1228_v33 }
  0x8d   :  { %770 = vmatmul.bf16.gmra.mxu1 %v1104_v34  ;;  %850 = vmatmul.bf16.gmra.mxu3 %v1232_v35 }
  0x9c   :  { %606 = vmatmul.bf16.gmra.mxu0 %v1108_v44  ;;  %686 = vmatmul.bf16.gmra.mxu2 %v1236_v45  ;;  %v1390_v44 = vld [vmem:[#allocation2 + $0xa4] sm:$0xf0]  ;;  %v1259_v45 = vld [vmem:[#allocation2 + $0x1a0] sm:$0xf] }
  0x9d   :  { %775 = vmatmul.bf16.gmra.mxu1 %v1112_v46  ;;  %855 = vmatmul.bf16.gmra.mxu3 %v1240_v47  ;;  %v1422_v46 = vld [vmem:[#allocation2 + $0x1a4] sm:$0xf0]  ;;  %v1389_v47 = vld [vmem:[#allocation2 + $0xa4] sm:$0xf]  ;;  %v1132_v56 = vor.u32 %v1390_v44, %v1131_v41 }
  0xa9   :  { %v572_v59 = vpop.f32.mrf.mxu0 }
  0xaa   :  { %v573_v62 = vadd.f32 %v1590_v48, %v572_v59  ;;  %v741_v63 = vpop.f32.mrf.mxu1  ;;  %v1136_v59 = vor.u32 %v1389_v47, %v1133_v49  ;;  %v1426_v47 = vld [vmem:[#allocation2 + $0x1c4] sm:$0xf0]  ;;  %v1393_v49 = vld [vmem:[#allocation2 + $0xc4] sm:$0xf] }
  0xac   :  { %v742_v0 = vadd.f32 %v741_v63, %v573_v62  ;;  %611 = vmatmul.bf16.gmra.mxu0 %v1116_v57  ;;  %691 = vmatmul.bf16.gmra.mxu2 %v1244_v58  ;;  %v1260_v57 = vor.u32 %v1422_v46, %v1259_v45  ;;  %v1394_v45 = vld [vmem:[#allocation2 + $0xc4] sm:$0xf0]  ;;  %v1275_v46 = vld [vmem:[#allocation2 + $0x1c0] sm:$0xf] }
  0xad   :  { %780 = vmatmul.bf16.gmra.mxu1 %v1120_v60  ;;  %860 = vmatmul.bf16.gmra.mxu3 %v1248_v61  ;;  %v1264_v60 = vor.u32 %v1421_v51, %v1261_v52  ;;  %v1425_v52 = vld [vmem:[#allocation2 + $0x1c4] sm:$0xf] }
  0xae   :  { %v901_v1 = vmax.f32 %v742_v0, 0.0 }
  0xaf   :  { %v652_v2 = vpop.f32.mrf.mxu2 }
  0xb0   :  { %965 = vst [vmem:[#allocation7] sm:$0xff] %v901_v1  ;;  %v653_v3 = vadd.f32 %v1590_v48, %v652_v2  ;;  %v821_v4 = vpop.f32.mrf.mxu3 }
  0xb1   :  { %v574_v5 = vpop.f32.mrf.mxu0 }
  0xb2   :  { %v822_v6 = vadd.f32 %v821_v4, %v653_v3  ;;  %v575_v7 = vadd.f32 %v1590_v48, %v574_v5  ;;  %v743_v8 = vpop.f32.mrf.mxu1 }
  0xb4   :  { %v933_v10 = vmax.f32 %v822_v6, 0.0  ;;  %v744_v11 = vadd.f32 %v743_v8, %v575_v7 }
  0xb6   :  { %997 = vst [vmem:[#allocation7 + $0x100] sm:$0xff] %v933_v10  ;;  %v902_v17 = vmax.f32 %v744_v11, 0.0  ;;  %v1139_v10 = vld [vmem:[#allocation2 + $0xb0] sm:$0xf] }
  0xb7   :  { %v654_v20 = vpop.f32.mrf.mxu2 }
  0xb8   :  { %966 = vst [vmem:[#allocation7 + $0x8] sm:$0xff] %v902_v17  ;;  %v655_v21 = vadd.f32 %v1590_v48, %v654_v20  ;;  %v823_v22 = vpop.f32.mrf.mxu3  ;;  %v1141_v17 = vld [vmem:[#allocation2 + $0xb8] sm:$0xf0] }
  0xb9   :  { %v577_v25 = vpop.f32.mrf.mxu0  ;;  %v1269_v20 = vld [vmem:[#allocation2 + $0x1b8] sm:$0xf0] }
  0xba   :  { %v824_v28 = vadd.f32 %v823_v22, %v655_v21  ;;  %v578_v29 = vadd.f32 %v1590_v48, %v577_v25  ;;  %v746_v30 = vpop.f32.mrf.mxu1  ;;  %v1268_v25 = vor.u32 %v1424_v15, %v1267_v14  ;;  %v1396_v14 = vld [vmem:[#allocation2 + $0xd4] sm:$0xf0]  ;;  %v1283_v15 = vld [vmem:[#allocation2 + $0x1d0] sm:$0xf] }
  0xbc   :  { %v934_v31 = vmax.f32 %v824_v28, 0.0  ;;  %v747_v32 = vadd.f32 %v746_v30, %v578_v29  ;;  %616 = vmatmul.bf16.gmra.mxu0 %v1124_v23  ;;  %696 = vmatmul.bf16.gmra.mxu2 %v1252_v24  ;;  %v1140_v24 = vor.u32 %v1392_v13, %v1139_v10  ;;  %v1272_v28 = vor.u32 %v1423_v19, %v1269_v20  ;;  %v1427_v20 = vld [vmem:[#allocation2 + $0x1d4] sm:$0xf] }
  0xbd   :  { %785 = vmatmul.bf16.gmra.mxu1 %v1128_v26  ;;  %865 = vmatmul.bf16.gmra.mxu3 %v1256_v27  ;;  %v1144_v27 = vor.u32 %v1391_v16, %v1141_v17  ;;  %v1428_v16 = vld [vmem:[#allocation2 + $0x1d4] sm:$0xf0]  ;;  %v1395_v17 = vld [vmem:[#allocation2 + $0xd4] sm:$0xf] }
  0xbe   :  { %998 = vst [vmem:[#allocation7 + $0x108] sm:$0xff] %v934_v31  ;;  %v903_v33 = vmax.f32 %v747_v32, 0.0 }
  0xbf   :  { %v657_v34 = vpop.f32.mrf.mxu2 }
  0xc0   :  { %967 = vst [vmem:[#allocation7 + $0x10] sm:$0xff] %v903_v33  ;;  %v658_v35 = vadd.f32 %v1590_v48, %v657_v34  ;;  %v826_v36 = vpop.f32.mrf.mxu3 }
  0xc1   :  { %v579_v37 = vpop.f32.mrf.mxu0 }
  0xc2   :  { %v827_v38 = vadd.f32 %v826_v36, %v658_v35  ;;  %v580_v39 = vadd.f32 %v1590_v48, %v579_v37  ;;  %v748_v40 = vpop.f32.mrf.mxu1 }
  0xc4   :  { %v935_v42 = vmax.f32 %v827_v38, 0.0  ;;  %v749_v43 = vadd.f32 %v748_v40, %v580_v39 }
  0xc6   :  { %999 = vst [vmem:[#allocation7 + $0x110] sm:$0xff] %v935_v42  ;;  %v904_v50 = vmax.f32 %v749_v43, 0.0  ;;  %v1147_v42 = vld [vmem:[#allocation2 + $0xc0] sm:$0xf] }
  0xc7   :  { %v659_v53 = vpop.f32.mrf.mxu2 }
  0xc8   :  { %968 = vst [vmem:[#allocation7 + $0x18] sm:$0xff] %v904_v50  ;;  %v660_v54 = vadd.f32 %v1590_v48, %v659_v53  ;;  %v828_v55 = vpop.f32.mrf.mxu3  ;;  %v1149_v50 = vld [vmem:[#allocation2 + $0xc8] sm:$0xf0] }
  0xc9   :  { %v582_v58 = vpop.f32.mrf.mxu0  ;;  %v1277_v53 = vld [vmem:[#allocation2 + $0x1c8] sm:$0xf0] }
  0xca   :  { %v829_v61 = vadd.f32 %v828_v55, %v660_v54  ;;  %v583_v62 = vadd.f32 %v1590_v48, %v582_v58  ;;  %v751_v63 = vpop.f32.mrf.mxu1  ;;  %v1276_v58 = vor.u32 %v1426_v47, %v1275_v46  ;;  %v1398_v46 = vld [vmem:[#allocation2 + $0xe4] sm:$0xf0]  ;;  %v1291_v47 = vld [vmem:[#allocation2 + $0x1e0] sm:$0xf] }
  0xcc   :  { %v936_v0 = vmax.f32 %v829_v61, 0.0  ;;  %v752_v1 = vadd.f32 %v751_v63, %v583_v62  ;;  %621 = vmatmul.bf16.gmra.mxu0 %v1132_v56  ;;  %701 = vmatmul.bf16.gmra.mxu2 %v1260_v57  ;;  %v1148_v57 = vor.u32 %v1394_v45, %v1147_v42  ;;  %v1280_v61 = vor.u32 %v1425_v52, %v1277_v53  ;;  %v1429_v53 = vld [vmem:[#allocation2 + $0x1e4] sm:$0xf] }
  0xcd   :  { %790 = vmatmul.bf16.gmra.mxu1 %v1136_v59  ;;  %870 = vmatmul.bf16.gmra.mxu3 %v1264_v60  ;;  %v1152_v60 = vor.u32 %v1393_v49, %v1149_v50  ;;  %v1430_v49 = vld [vmem:[#allocation2 + $0x1e4] sm:$0xf0]  ;;  %v1397_v50 = vld [vmem:[#allocation2 + $0xe4] sm:$0xf] }
  0xce   :  { %1000 = vst [vmem:[#allocation7 + $0x118] sm:$0xff] %v936_v0  ;;  %v905_v2 = vmax.f32 %v752_v1, 0.0 }
  0xcf   :  { %v662_v3 = vpop.f32.mrf.mxu2 }
  0xd0   :  { %969 = vst [vmem:[#allocation7 + $0x20] sm:$0xff] %v905_v2  ;;  %v663_v4 = vadd.f32 %v1590_v48, %v662_v3  ;;  %v831_v5 = vpop.f32.mrf.mxu3 }
  0xd1   :  { %v584_v6 = vpop.f32.mrf.mxu0 }
  0xd2   :  { %v832_v7 = vadd.f32 %v831_v5, %v663_v4  ;;  %v585_v8 = vadd.f32 %v1590_v48, %v584_v6  ;;  %v753_v9 = vpop.f32.mrf.mxu1 }
  0xd4   :  { %v937_v11 = vmax.f32 %v832_v7, 0.0  ;;  %v754_v12 = vadd.f32 %v753_v9, %v585_v8 }
  0xd6   :  { %1001 = vst [vmem:[#allocation7 + $0x120] sm:$0xff] %v937_v11  ;;  %v906_v18 = vmax.f32 %v754_v12, 0.0  ;;  %v1155_v11 = vld [vmem:[#allocation2 + $0xd0] sm:$0xf] }
  0xd7   :  { %v664_v21 = vpop.f32.mrf.mxu2 }
  0xd8   :  { %970 = vst [vmem:[#allocation7 + $0x28] sm:$0xff] %v906_v18  ;;  %v665_v22 = vadd.f32 %v1590_v48, %v664_v21  ;;  %v833_v23 = vpop.f32.mrf.mxu3  ;;  %v1157_v18 = vld [vmem:[#allocation2 + $0xd8] sm:$0xf0] }
  0xd9   :  { %v587_v26 = vpop.f32.mrf.mxu0  ;;  %v1285_v21 = vld [vmem:[#allocation2 + $0x1d8] sm:$0xf0] }
  0xda   :  { %v834_v29 = vadd.f32 %v833_v23, %v665_v22  ;;  %v588_v30 = vadd.f32 %v1590_v48, %v587_v26  ;;  %v756_v31 = vpop.f32.mrf.mxu1  ;;  %v1284_v26 = vor.u32 %v1428_v16, %v1283_v15  ;;  %v1400_v15 = vld [vmem:[#allocation2 + $0xf4] sm:$0xf0]  ;;  %v1299_v16 = vld [vmem:[#allocation2 + $0x1f0] sm:$0xf] }
  0xdc   :  { %v938_v32 = vmax.f32 %v834_v29, 0.0  ;;  %v757_v33 = vadd.f32 %v756_v31, %v588_v30  ;;  %626 = vmatmul.bf16.gmra.mxu0 %v1140_v24  ;;  %706 = vmatmul.bf16.gmra.mxu2 %v1268_v25  ;;  %v1156_v25 = vor.u32 %v1396_v14, %v1155_v11  ;;  %v1288_v29 = vor.u32 %v1427_v20, %v1285_v21  ;;  %v1431_v21 = vld [vmem:[#allocation2 + $0x1f4] sm:$0xf] }
  0xdd   :  { %795 = vmatmul.bf16.gmra.mxu1 %v1144_v27  ;;  %875 = vmatmul.bf16.gmra.mxu3 %v1272_v28  ;;  %v1160_v28 = vor.u32 %v1395_v17, %v1157_v18  ;;  %v1432_v17 = vld [vmem:[#allocation2 + $0x1f4] sm:$0xf0]  ;;  %v1399_v18 = vld [vmem:[#allocation2 + $0xf4] sm:$0xf] }
  0xde   :  { %1002 = vst [vmem:[#allocation7 + $0x128] sm:$0xff] %v938_v32  ;;  %v907_v34 = vmax.f32 %v757_v33, 0.0 }
  0xdf   :  { %v667_v35 = vpop.f32.mrf.mxu2 }
  0xe0   :  { %971 = vst [vmem:[#allocation7 + $0x30] sm:$0xff] %v907_v34  ;;  %v668_v36 = vadd.f32 %v1590_v48, %v667_v35  ;;  %v836_v37 = vpop.f32.mrf.mxu3 }
  0xe1   :  { %v589_v38 = vpop.f32.mrf.mxu0 }
  0xe2   :  { %v837_v39 = vadd.f32 %v836_v37, %v668_v36  ;;  %v590_v40 = vadd.f32 %v1590_v48, %v589_v38  ;;  %v758_v41 = vpop.f32.mrf.mxu1 }
  0xe4   :  { %v939_v43 = vmax.f32 %v837_v39, 0.0  ;;  %v759_v44 = vadd.f32 %v758_v41, %v590_v40 }
  0xe6   :  { %1003 = vst [vmem:[#allocation7 + $0x130] sm:$0xff] %v939_v43  ;;  %v908_v51 = vmax.f32 %v759_v44, 0.0  ;;  %v1163_v43 = vld [vmem:[#allocation2 + $0xe0] sm:$0xf] }
  0xe7   :  { %v669_v54 = vpop.f32.mrf.mxu2 }
  0xe8   :  { %972 = vst [vmem:[#allocation7 + $0x38] sm:$0xff] %v908_v51  ;;  %v670_v55 = vadd.f32 %v1590_v48, %v669_v54  ;;  %v838_v56 = vpop.f32.mrf.mxu3  ;;  %v1165_v51 = vld [vmem:[#allocation2 + $0xe8] sm:$0xf0] }
  0xe9   :  { %v592_v59 = vpop.f32.mrf.mxu0  ;;  %v1293_v54 = vld [vmem:[#allocation2 + $0x1e8] sm:$0xf0] }
  0xea   :  { %v839_v62 = vadd.f32 %v838_v56, %v670_v55  ;;  %v593_v63 = vadd.f32 %v1590_v48, %v592_v59  ;;  %v761_v0 = vpop.f32.mrf.mxu1  ;;  %v1292_v59 = vor.u32 %v1430_v49, %v1291_v47 }
  0xec   :  { %v940_v1 = vmax.f32 %v839_v62, 0.0  ;;  %v762_v2 = vadd.f32 %v761_v0, %v593_v63  ;;  %631 = vmatmul.bf16.gmra.mxu0 %v1148_v57  ;;  %711 = vmatmul.bf16.gmra.mxu2 %v1276_v58  ;;  %v1164_v58 = vor.u32 %v1398_v46, %v1163_v43  ;;  %v1296_v62 = vor.u32 %v1429_v53, %v1293_v54 }
  0xed   :  { %800 = vmatmul.bf16.gmra.mxu1 %v1152_v60  ;;  %880 = vmatmul.bf16.gmra.mxu3 %v1280_v61  ;;  %v1168_v61 = vor.u32 %v1397_v50, %v1165_v51 }
  0xee   :  { %1004 = vst [vmem:[#allocation7 + $0x138] sm:$0xff] %v940_v1  ;;  %v909_v3 = vmax.f32 %v762_v2, 0.0 }
  0xef   :  { %v672_v4 = vpop.f32.mrf.mxu2 }
  0xf0   :  { %973 = vst [vmem:[#allocation7 + $0x40] sm:$0xff] %v909_v3  ;;  %v673_v5 = vadd.f32 %v1590_v48, %v672_v4  ;;  %v841_v6 = vpop.f32.mrf.mxu3 }
  0xf1   :  { %v594_v7 = vpop.f32.mrf.mxu0 }
  0xf2   :  { %v842_v8 = vadd.f32 %v841_v6, %v673_v5  ;;  %v595_v9 = vadd.f32 %v1590_v48, %v594_v7  ;;  %v763_v10 = vpop.f32.mrf.mxu1 }
  0xf4   :  { %v941_v12 = vmax.f32 %v842_v8, 0.0  ;;  %v764_v13 = vadd.f32 %v763_v10, %v595_v9 }
  0xf6   :  { %1005 = vst [vmem:[#allocation7 + $0x140] sm:$0xff] %v941_v12  ;;  %v910_v19 = vmax.f32 %v764_v13, 0.0  ;;  %v1171_v12 = vld [vmem:[#allocation2 + $0xf0] sm:$0xf] }
  0xf7   :  { %v674_v22 = vpop.f32.mrf.mxu2 }
  0xf8   :  { %974 = vst [vmem:[#allocation7 + $0x48] sm:$0xff] %v910_v19  ;;  %v675_v23 = vadd.f32 %v1590_v48, %v674_v22  ;;  %v843_v24 = vpop.f32.mrf.mxu3  ;;  %v1173_v19 = vld [vmem:[#allocation2 + $0xf8] sm:$0xf0] }
  0xf9   :  { %v597_v27 = vpop.f32.mrf.mxu0  ;;  %v1301_v22 = vld [vmem:[#allocation2 + $0x1f8] sm:$0xf0] }
  0xfa   :  { %v844_v30 = vadd.f32 %v843_v24, %v675_v23  ;;  %v598_v31 = vadd.f32 %v1590_v48, %v597_v27  ;;  %v766_v32 = vpop.f32.mrf.mxu1  ;;  %v1300_v27 = vor.u32 %v1432_v17, %v1299_v16 }
  0xfc   :  { %v942_v33 = vmax.f32 %v844_v30, 0.0  ;;  %v767_v34 = vadd.f32 %v766_v32, %v598_v31  ;;  %636 = vmatmul.bf16.gmra.mxu0 %v1156_v25  ;;  %716 = vmatmul.bf16.gmra.mxu2 %v1284_v26  ;;  %v1172_v26 = vor.u32 %v1400_v15, %v1171_v12  ;;  %v1304_v30 = vor.u32 %v1431_v21, %v1301_v22 }
  0xfd   :  { %805 = vmatmul.bf16.gmra.mxu1 %v1160_v28  ;;  %885 = vmatmul.bf16.gmra.mxu3 %v1288_v29  ;;  %v1176_v29 = vor.u32 %v1399_v18, %v1173_v19 }
  0xfe   :  { %1006 = vst [vmem:[#allocation7 + $0x148] sm:$0xff] %v942_v33  ;;  %v911_v35 = vmax.f32 %v767_v34, 0.0 }
  0xff   :  { %v677_v36 = vpop.f32.mrf.mxu2 }
 0x100   :  { %975 = vst [vmem:[#allocation7 + $0x50] sm:$0xff] %v911_v35  ;;  %v678_v37 = vadd.f32 %v1590_v48, %v677_v36  ;;  %v846_v38 = vpop.f32.mrf.mxu3 }
 0x101   :  { %v599_v39 = vpop.f32.mrf.mxu0 }
 0x102   :  { %v847_v40 = vadd.f32 %v846_v38, %v678_v37  ;;  %v600_v41 = vadd.f32 %v1590_v48, %v599_v39  ;;  %v768_v42 = vpop.f32.mrf.mxu1 }
 0x104   :  { %v943_v44 = vmax.f32 %v847_v40, 0.0  ;;  %v769_v45 = vadd.f32 %v768_v42, %v600_v41 }
 0x106   :  { %1007 = vst [vmem:[#allocation7 + $0x150] sm:$0xff] %v943_v44  ;;  %v912_v52 = vmax.f32 %v769_v45, 0.0 }
 0x107   :  { %v679_v55 = vpop.f32.mrf.mxu2 }
 0x108   :  { %976 = vst [vmem:[#allocation7 + $0x58] sm:$0xff] %v912_v52  ;;  %v680_v56 = vadd.f32 %v1590_v48, %v679_v55  ;;  %v848_v57 = vpop.f32.mrf.mxu3 }
 0x109   :  { %v602_v60 = vpop.f32.mrf.mxu0 }
 0x10a   :  { %v849_v63 = vadd.f32 %v848_v57, %v680_v56  ;;  %v603_v0 = vadd.f32 %v1590_v48, %v602_v60  ;;  %v771_v1 = vpop.f32.mrf.mxu1 }
 0x10c   :  { %v944_v2 = vmax.f32 %v849_v63, 0.0  ;;  %v772_v3 = vadd.f32 %v771_v1, %v603_v0  ;;  %641 = vmatmul.bf16.gmra.mxu0 %v1164_v58  ;;  %721 = vmatmul.bf16.gmra.mxu2 %v1292_v59 }
 0x10d   :  { %810 = vmatmul.bf16.gmra.mxu1 %v1168_v61  ;;  %890 = vmatmul.bf16.gmra.mxu3 %v1296_v62 }
 0x10e   :  { %1008 = vst [vmem:[#allocation7 + $0x158] sm:$0xff] %v944_v2  ;;  %v913_v4 = vmax.f32 %v772_v3, 0.0 }
 0x10f   :  { %v682_v5 = vpop.f32.mrf.mxu2 }
 0x110   :  { %977 = vst [vmem:[#allocation7 + $0x60] sm:$0xff] %v913_v4  ;;  %v683_v6 = vadd.f32 %v1590_v48, %v682_v5  ;;  %v851_v7 = vpop.f32.mrf.mxu3 }
 0x111   :  { %v604_v8 = vpop.f32.mrf.mxu0 }
 0x112   :  { %v852_v9 = vadd.f32 %v851_v7, %v683_v6  ;;  %v605_v10 = vadd.f32 %v1590_v48, %v604_v8  ;;  %v773_v11 = vpop.f32.mrf.mxu1 }
 0x114   :  { %v945_v13 = vmax.f32 %v852_v9, 0.0  ;;  %v774_v14 = vadd.f32 %v773_v11, %v605_v10 }
 0x116   :  { %1009 = vst [vmem:[#allocation7 + $0x160] sm:$0xff] %v945_v13  ;;  %v914_v20 = vmax.f32 %v774_v14, 0.0 }
 0x117   :  { %v684_v23 = vpop.f32.mrf.mxu2 }
 0x118   :  { %978 = vst [vmem:[#allocation7 + $0x68] sm:$0xff] %v914_v20  ;;  %v685_v24 = vadd.f32 %v1590_v48, %v684_v23  ;;  %v853_v25 = vpop.f32.mrf.mxu3 }
 0x119   :  { %v607_v28 = vpop.f32.mrf.mxu0 }
 0x11a   :  { %v854_v31 = vadd.f32 %v853_v25, %v685_v24  ;;  %v608_v32 = vadd.f32 %v1590_v48, %v607_v28  ;;  %v776_v33 = vpop.f32.mrf.mxu1 }
 0x11c   :  { %v946_v34 = vmax.f32 %v854_v31, 0.0  ;;  %v777_v35 = vadd.f32 %v776_v33, %v608_v32  ;;  %646 = vmatmul.bf16.gmra.mxu0 %v1172_v26  ;;  %726 = vmatmul.bf16.gmra.mxu2 %v1300_v27 }
 0x11d   :  { %815 = vmatmul.bf16.gmra.mxu1 %v1176_v29  ;;  %895 = vmatmul.bf16.gmra.mxu3 %v1304_v30 }
 0x11e   :  { %1010 = vst [vmem:[#allocation7 + $0x168] sm:$0xff] %v946_v34  ;;  %v915_v36 = vmax.f32 %v777_v35, 0.0 }
 0x11f   :  { %v687_v37 = vpop.f32.mrf.mxu2 }
 0x120   :  { %979 = vst [vmem:[#allocation7 + $0x70] sm:$0xff] %v915_v36  ;;  %v688_v38 = vadd.f32 %v1590_v48, %v687_v37  ;;  %v856_v39 = vpop.f32.mrf.mxu3 }
 0x121   :  { %v609_v40 = vpop.f32.mrf.mxu0 }
 0x122   :  { %v857_v41 = vadd.f32 %v856_v39, %v688_v38  ;;  %v610_v42 = vadd.f32 %v1590_v48, %v609_v40  ;;  %v778_v43 = vpop.f32.mrf.mxu1 }
 0x124   :  { %v947_v44 = vmax.f32 %v857_v41, 0.0  ;;  %v779_v45 = vadd.f32 %v778_v43, %v610_v42 }
 0x126   :  { %1011 = vst [vmem:[#allocation7 + $0x170] sm:$0xff] %v947_v44  ;;  %v916_v46 = vmax.f32 %v779_v45, 0.0 }
 0x127   :  { %v689_v47 = vpop.f32.mrf.mxu2 }
 0x128   :  { %980 = vst [vmem:[#allocation7 + $0x78] sm:$0xff] %v916_v46  ;;  %v690_v49 = vadd.f32 %v1590_v48, %v689_v47  ;;  %v858_v50 = vpop.f32.mrf.mxu3 }
 0x129   :  { %v612_v51 = vpop.f32.mrf.mxu0 }
 0x12a   :  { %v859_v52 = vadd.f32 %v858_v50, %v690_v49  ;;  %v613_v53 = vadd.f32 %v1590_v48, %v612_v51  ;;  %v781_v54 = vpop.f32.mrf.mxu1 }
 0x12c   :  { %v948_v55 = vmax.f32 %v859_v52, 0.0  ;;  %v782_v56 = vadd.f32 %v781_v54, %v613_v53 }
 0x12e   :  { %1012 = vst [vmem:[#allocation7 + $0x178] sm:$0xff] %v948_v55  ;;  %v917_v57 = vmax.f32 %v782_v56, 0.0 }
 0x12f   :  { %v692_v58 = vpop.f32.mrf.mxu2 }
 0x130   :  { %981 = vst [vmem:[#allocation7 + $0x80] sm:$0xff] %v917_v57  ;;  %v693_v59 = vadd.f32 %v1590_v48, %v692_v58  ;;  %v861_v60 = vpop.f32.mrf.mxu3 }
 0x131   :  { %v614_v61 = vpop.f32.mrf.mxu0 }
 0x132   :  { %v862_v62 = vadd.f32 %v861_v60, %v693_v59  ;;  %v615_v63 = vadd.f32 %v1590_v48, %v614_v61  ;;  %v783_v0 = vpop.f32.mrf.mxu1 }
 0x134   :  { %v949_v1 = vmax.f32 %v862_v62, 0.0  ;;  %v784_v2 = vadd.f32 %v783_v0, %v615_v63 }
 0x136   :  { %1013 = vst [vmem:[#allocation7 + $0x180] sm:$0xff] %v949_v1  ;;  %v918_v3 = vmax.f32 %v784_v2, 0.0 }
 0x137   :  { %v694_v4 = vpop.f32.mrf.mxu2 }
 0x138   :  { %982 = vst [vmem:[#allocation7 + $0x88] sm:$0xff] %v918_v3  ;;  %v695_v5 = vadd.f32 %v1590_v48, %v694_v4  ;;  %v863_v6 = vpop.f32.mrf.mxu3 }
 0x139   :  { %v617_v7 = vpop.f32.mrf.mxu0 }
 0x13a   :  { %v864_v8 = vadd.f32 %v863_v6, %v695_v5  ;;  %v618_v9 = vadd.f32 %v1590_v48, %v617_v7  ;;  %v786_v10 = vpop.f32.mrf.mxu1 }
 0x13c   :  { %v950_v11 = vmax.f32 %v864_v8, 0.0  ;;  %v787_v12 = vadd.f32 %v786_v10, %v618_v9 }
 0x13e   :  { %1014 = vst [vmem:[#allocation7 + $0x188] sm:$0xff] %v950_v11  ;;  %v919_v13 = vmax.f32 %v787_v12, 0.0 }
 0x13f   :  { %v697_v14 = vpop.f32.mrf.mxu2 }
 0x140   :  { %983 = vst [vmem:[#allocation7 + $0x90] sm:$0xff] %v919_v13  ;;  %v698_v15 = vadd.f32 %v1590_v48, %v697_v14  ;;  %v866_v16 = vpop.f32.mrf.mxu3 }
 0x141   :  { %v619_v17 = vpop.f32.mrf.mxu0 }
 0x142   :  { %v867_v18 = vadd.f32 %v866_v16, %v698_v15  ;;  %v620_v19 = vadd.f32 %v1590_v48, %v619_v17  ;;  %v788_v20 = vpop.f32.mrf.mxu1 }
 0x144   :  { %v951_v21 = vmax.f32 %v867_v18, 0.0  ;;  %v789_v22 = vadd.f32 %v788_v20, %v620_v19 }
 0x146   :  { %1015 = vst [vmem:[#allocation7 + $0x190] sm:$0xff] %v951_v21  ;;  %v920_v23 = vmax.f32 %v789_v22, 0.0 }
 0x147   :  { %v699_v24 = vpop.f32.mrf.mxu2 }
 0x148   :  { %984 = vst [vmem:[#allocation7 + $0x98] sm:$0xff] %v920_v23  ;;  %v700_v25 = vadd.f32 %v1590_v48, %v699_v24  ;;  %v868_v26 = vpop.f32.mrf.mxu3 }
 0x149   :  { %v622_v27 = vpop.f32.mrf.mxu0 }
 0x14a   :  { %v869_v28 = vadd.f32 %v868_v26, %v700_v25  ;;  %v623_v29 = vadd.f32 %v1590_v48, %v622_v27  ;;  %v791_v30 = vpop.f32.mrf.mxu1 }
 0x14c   :  { %v952_v31 = vmax.f32 %v869_v28, 0.0  ;;  %v792_v32 = vadd.f32 %v791_v30, %v623_v29 }
 0x14e   :  { %1016 = vst [vmem:[#allocation7 + $0x198] sm:$0xff] %v952_v31  ;;  %v921_v33 = vmax.f32 %v792_v32, 0.0 }
 0x14f   :  { %v702_v34 = vpop.f32.mrf.mxu2 }
 0x150   :  { %985 = vst [vmem:[#allocation7 + $0xa0] sm:$0xff] %v921_v33  ;;  %v703_v35 = vadd.f32 %v1590_v48, %v702_v34  ;;  %v871_v36 = vpop.f32.mrf.mxu3 }
 0x151   :  { %v624_v37 = vpop.f32.mrf.mxu0 }
 0x152   :  { %v872_v38 = vadd.f32 %v871_v36, %v703_v35  ;;  %v625_v39 = vadd.f32 %v1590_v48, %v624_v37  ;;  %v793_v40 = vpop.f32.mrf.mxu1 }
 0x154   :  { %v953_v41 = vmax.f32 %v872_v38, 0.0  ;;  %v794_v42 = vadd.f32 %v793_v40, %v625_v39 }
 0x156   :  { %1017 = vst [vmem:[#allocation7 + $0x1a0] sm:$0xff] %v953_v41  ;;  %v922_v43 = vmax.f32 %v794_v42, 0.0 }
 0x157   :  { %v704_v44 = vpop.f32.mrf.mxu2 }
 0x158   :  { %986 = vst [vmem:[#allocation7 + $0xa8] sm:$0xff] %v922_v43  ;;  %v705_v45 = vadd.f32 %v1590_v48, %v704_v44  ;;  %v873_v46 = vpop.f32.mrf.mxu3 }
 0x159   :  { %v627_v47 = vpop.f32.mrf.mxu0 }
 0x15a   :  { %v874_v49 = vadd.f32 %v873_v46, %v705_v45  ;;  %v628_v50 = vadd.f32 %v1590_v48, %v627_v47  ;;  %v796_v51 = vpop.f32.mrf.mxu1 }
 0x15c   :  { %v954_v52 = vmax.f32 %v874_v49, 0.0  ;;  %v797_v53 = vadd.f32 %v796_v51, %v628_v50 }
 0x15e   :  { %1018 = vst [vmem:[#allocation7 + $0x1a8] sm:$0xff] %v954_v52  ;;  %v923_v54 = vmax.f32 %v797_v53, 0.0 }
 0x15f   :  { %v707_v55 = vpop.f32.mrf.mxu2 }
 0x160   :  { %987 = vst [vmem:[#allocation7 + $0xb0] sm:$0xff] %v923_v54  ;;  %v708_v56 = vadd.f32 %v1590_v48, %v707_v55  ;;  %v876_v57 = vpop.f32.mrf.mxu3 }
 0x161   :  { %v629_v58 = vpop.f32.mrf.mxu0 }
 0x162   :  { %v877_v59 = vadd.f32 %v876_v57, %v708_v56  ;;  %v630_v60 = vadd.f32 %v1590_v48, %v629_v58  ;;  %v798_v61 = vpop.f32.mrf.mxu1 }
 0x164   :  { %v955_v62 = vmax.f32 %v877_v59, 0.0  ;;  %v799_v63 = vadd.f32 %v798_v61, %v630_v60 }
 0x166   :  { %1019 = vst [vmem:[#allocation7 + $0x1b0] sm:$0xff] %v955_v62  ;;  %v924_v0 = vmax.f32 %v799_v63, 0.0 }
 0x167   :  { %v709_v1 = vpop.f32.mrf.mxu2 }
 0x168   :  { %988 = vst [vmem:[#allocation7 + $0xb8] sm:$0xff] %v924_v0  ;;  %v710_v2 = vadd.f32 %v1590_v48, %v709_v1  ;;  %v878_v3 = vpop.f32.mrf.mxu3 }
 0x169   :  { %v632_v4 = vpop.f32.mrf.mxu0 }
 0x16a   :  { %v879_v5 = vadd.f32 %v878_v3, %v710_v2  ;;  %v633_v6 = vadd.f32 %v1590_v48, %v632_v4  ;;  %v801_v7 = vpop.f32.mrf.mxu1 }
 0x16c   :  { %v956_v8 = vmax.f32 %v879_v5, 0.0  ;;  %v802_v9 = vadd.f32 %v801_v7, %v633_v6 }
 0x16e   :  { %1020 = vst [vmem:[#allocation7 + $0x1b8] sm:$0xff] %v956_v8  ;;  %v925_v10 = vmax.f32 %v802_v9, 0.0 }
 0x16f   :  { %v712_v11 = vpop.f32.mrf.mxu2 }
 0x170   :  { %989 = vst [vmem:[#allocation7 + $0xc0] sm:$0xff] %v925_v10  ;;  %v713_v12 = vadd.f32 %v1590_v48, %v712_v11  ;;  %v881_v13 = vpop.f32.mrf.mxu3 }
 0x171   :  { %v634_v14 = vpop.f32.mrf.mxu0 }
 0x172   :  { %v882_v15 = vadd.f32 %v881_v13, %v713_v12  ;;  %v635_v16 = vadd.f32 %v1590_v48, %v634_v14  ;;  %v803_v17 = vpop.f32.mrf.mxu1 }
 0x174   :  { %v957_v18 = vmax.f32 %v882_v15, 0.0  ;;  %v804_v19 = vadd.f32 %v803_v17, %v635_v16 }
 0x176   :  { %1021 = vst [vmem:[#allocation7 + $0x1c0] sm:$0xff] %v957_v18  ;;  %v926_v20 = vmax.f32 %v804_v19, 0.0 }
 0x177   :  { %v714_v21 = vpop.f32.mrf.mxu2 }
 0x178   :  { %990 = vst [vmem:[#allocation7 + $0xc8] sm:$0xff] %v926_v20  ;;  %v715_v22 = vadd.f32 %v1590_v48, %v714_v21  ;;  %v883_v23 = vpop.f32.mrf.mxu3 }
 0x179   :  { %v637_v24 = vpop.f32.mrf.mxu0 }
 0x17a   :  { %v884_v25 = vadd.f32 %v883_v23, %v715_v22  ;;  %v638_v26 = vadd.f32 %v1590_v48, %v637_v24  ;;  %v806_v27 = vpop.f32.mrf.mxu1 }
 0x17c   :  { %v958_v28 = vmax.f32 %v884_v25, 0.0  ;;  %v807_v29 = vadd.f32 %v806_v27, %v638_v26 }
 0x17e   :  { %1022 = vst [vmem:[#allocation7 + $0x1c8] sm:$0xff] %v958_v28  ;;  %v927_v30 = vmax.f32 %v807_v29, 0.0 }
 0x17f   :  { %v717_v31 = vpop.f32.mrf.mxu2 }
 0x180   :  { %991 = vst [vmem:[#allocation7 + $0xd0] sm:$0xff] %v927_v30  ;;  %v718_v32 = vadd.f32 %v1590_v48, %v717_v31  ;;  %v886_v33 = vpop.f32.mrf.mxu3 }
 0x181   :  { %v639_v34 = vpop.f32.mrf.mxu0 }
 0x182   :  { %v887_v35 = vadd.f32 %v886_v33, %v718_v32  ;;  %v640_v36 = vadd.f32 %v1590_v48, %v639_v34  ;;  %v808_v37 = vpop.f32.mrf.mxu1 }
 0x184   :  { %v959_v38 = vmax.f32 %v887_v35, 0.0  ;;  %v809_v39 = vadd.f32 %v808_v37, %v640_v36 }
 0x186   :  { %1023 = vst [vmem:[#allocation7 + $0x1d0] sm:$0xff] %v959_v38  ;;  %v928_v40 = vmax.f32 %v809_v39, 0.0 }
 0x187   :  { %v719_v41 = vpop.f32.mrf.mxu2 }
 0x188   :  { %992 = vst [vmem:[#allocation7 + $0xd8] sm:$0xff] %v928_v40  ;;  %v720_v42 = vadd.f32 %v1590_v48, %v719_v41  ;;  %v888_v43 = vpop.f32.mrf.mxu3 }
 0x189   :  { %v642_v44 = vpop.f32.mrf.mxu0 }
 0x18a   :  { %v889_v45 = vadd.f32 %v888_v43, %v720_v42  ;;  %v643_v46 = vadd.f32 %v1590_v48, %v642_v44  ;;  %v811_v47 = vpop.f32.mrf.mxu1 }
 0x18c   :  { %v960_v49 = vmax.f32 %v889_v45, 0.0  ;;  %v812_v50 = vadd.f32 %v811_v47, %v643_v46 }
 0x18e   :  { %1024 = vst [vmem:[#allocation7 + $0x1d8] sm:$0xff] %v960_v49  ;;  %v929_v51 = vmax.f32 %v812_v50, 0.0 }
 0x18f   :  { %v722_v52 = vpop.f32.mrf.mxu2 }
 0x190   :  { %993 = vst [vmem:[#allocation7 + $0xe0] sm:$0xff] %v929_v51  ;;  %v723_v53 = vadd.f32 %v1590_v48, %v722_v52  ;;  %v891_v54 = vpop.f32.mrf.mxu3 }
 0x191   :  { %v644_v55 = vpop.f32.mrf.mxu0 }
 0x192   :  { %v892_v56 = vadd.f32 %v891_v54, %v723_v53  ;;  %v645_v57 = vadd.f32 %v1590_v48, %v644_v55  ;;  %v813_v58 = vpop.f32.mrf.mxu1 }
 0x194   :  { %v961_v59 = vmax.f32 %v892_v56, 0.0  ;;  %v814_v60 = vadd.f32 %v813_v58, %v645_v57 }
 0x196   :  { %1025 = vst [vmem:[#allocation7 + $0x1e0] sm:$0xff] %v961_v59  ;;  %v930_v61 = vmax.f32 %v814_v60, 0.0 }
 0x197   :  { %v724_v62 = vpop.f32.mrf.mxu2 }
 0x198   :  { %994 = vst [vmem:[#allocation7 + $0xe8] sm:$0xff] %v930_v61  ;;  %v725_v63 = vadd.f32 %v1590_v48, %v724_v62  ;;  %v893_v0 = vpop.f32.mrf.mxu3 }
 0x199   :  { %v647_v1 = vpop.f32.mrf.mxu0 }
 0x19a   :  { %v894_v2 = vadd.f32 %v893_v0, %v725_v63  ;;  %v648_v3 = vadd.f32 %v1590_v48, %v647_v1  ;;  %v816_v4 = vpop.f32.mrf.mxu1 }
 0x19c   :  { %v962_v5 = vmax.f32 %v894_v2, 0.0  ;;  %v817_v6 = vadd.f32 %v816_v4, %v648_v3 }
 0x19e   :  { %1026 = vst [vmem:[#allocation7 + $0x1e8] sm:$0xff] %v962_v5  ;;  %v931_v7 = vmax.f32 %v817_v6, 0.0 }
 0x19f   :  { %v727_v8 = vpop.f32.mrf.mxu2 }
 0x1a0   :  { %995 = vst [vmem:[#allocation7 + $0xf0] sm:$0xff] %v931_v7  ;;  %v728_v9 = vadd.f32 %v1590_v48, %v727_v8  ;;  %v896_v10 = vpop.f32.mrf.mxu3 }
 0x1a1   :  { %v649_v11 = vpop.f32.mrf.mxu0 }
 0x1a2   :  { %v897_v12 = vadd.f32 %v896_v10, %v728_v9  ;;  %v650_v13 = vadd.f32 %v1590_v48, %v649_v11  ;;  %v818_v14 = vpop.f32.mrf.mxu1 }
 0x1a4   :  { %v963_v15 = vmax.f32 %v897_v12, 0.0  ;;  %v819_v16 = vadd.f32 %v818_v14, %v650_v13 }
 0x1a6   :  { %1027 = vst [vmem:[#allocation7 + $0x1f0] sm:$0xff] %v963_v15  ;;  %v932_v17 = vmax.f32 %v819_v16, 0.0 }
 0x1a7   :  { %v729_v18 = vpop.f32.mrf.mxu2 }
 0x1a8   :  { %996 = vst [vmem:[#allocation7 + $0xf8] sm:$0xff] %v932_v17  ;;  %v730_v19 = vadd.f32 %v1590_v48, %v729_v18  ;;  %v898_v20 = vpop.f32.mrf.mxu3 }
 0x1aa   :  { %v899_v21 = vadd.f32 %v898_v20, %v730_v19 }
 0x1ac   :  { %v964_v22 = vmax.f32 %v899_v21, 0.0 }
 0x1ae   :  { %1028 = vst [vmem:[#allocation7 + $0x1f8] sm:$0xff] %v964_v22 }
 0x1af   :  { %1041 = dma.vmem_to_hbm [thread:$0]  %s1034_s26, 8192, %s1036_s29, [#allocation4], %s1552_s20, %s1552_s20, %s1553_s21  }
 0x1b0   :  { %1549 = dma.done.wait [#allocation4], 8192  }
 0x1b1   :  { %1550 = vsyncadd [#allocation4], 4294959104 }
 0x1b2   :  { %1046 = vsyncpa [#allocation3], 1 }
 0x1b3   :  { %1047 = vsyncpa [#allocation6], 1 }
 0x1b4   :  { %1048 = vsyncpa [#allocation4], 1 }

</bundles_post_ra>
